<compile_context>
chip_gen: v7x
topology: tpu7x:2x2x1
jax: 0.10.0
libtpu: 0.0.40
codegen_flags: <defaults>
</compile_context>

<pallas_src>
import math
import functools

import jax
import jax.numpy as jnp
from jax.experimental import pallas as pl
from jax.experimental.pallas import tpu as pltpu


def _layer_norm_kernel(x_ref, a2_ref, b2_ref, o_ref, *, eps):
    x = x_ref[...].astype(jnp.float32)                      # (TR, F)
    f = x.shape[-1]

    mean = jnp.mean(x, axis=-1, keepdims=True)
    diff = x - mean
    # Unbiased variance (torch.std default); eps added to std, not var.
    # f == 1 is degenerate (0/0 -> NaN), matching torch.std of a single element.
    var_unbiased = jnp.sum(diff * diff, axis=-1, keepdims=True) / (f - 1)
    std = jnp.sqrt(var_unbiased)
    # Exact reciprocal of the (TR, 1) column; cheap (TR divides) and exact,
    # then broadcast-multiply over the tile.
    inv = 1.0 / (std + eps)

    o_ref[...] = (a2_ref[...] * (diff * inv) + b2_ref[...]).astype(o_ref.dtype)


def _vmem_limit_bytes():
    """Per-generation scoped-VMEM budget: ~3/4 of physical capacity.

    -> ~48 MiB on v7x (64 MiB/TC), ~96 MiB on v5e/v6e (128 MiB), leaving
    headroom for compiler internal scratch and the pipeline machinery.
    """
    cap = None
    try:
        cap = getattr(pltpu.get_tpu_info(), "vmem_capacity_bytes", None)
    except Exception:
        cap = None
    if not cap:
        cap = 64 * 1024 * 1024  # conservative fallback = smallest (v7x per-TC)
    return (int(cap) * 3) // 4


def _choose_row_tile(rows, feat, itemsize, tile_budget_bytes):
    """Largest row tile that keeps full double-buffering within the budget."""
    # Sub-32-bit dtypes pack along sublanes: 8 rows for f32, 16 bf16, 32 int8.
    sublane = max(8, 32 // max(int(itemsize), 1))
    # Per-row VMEM cost of one grid step:
    #   in + out blocks, each double-buffered by the pipeline: 4 * F * itemsize
    #   f32 working copies inside the body (x, diff, result):  ~3 * F * 4
    per_row = 4 * feat * itemsize + 3 * feat * 4
    rt = tile_budget_bytes // max(per_row, 1)
    rt = min(rt, 2048)                                   # diminishing returns
    rt = min(rt, pl.cdiv(rows, sublane) * sublane)       # don't exceed problem
    rt = max(sublane, (rt // sublane) * sublane)
    return int(rt)


def layer_norm(x, a2, b2, *, eps=1e-6):
    """LayerNorm over the last axis. x: (..., F); a2, b2: (F,)."""
    F = x.shape[-1]
    lead = x.shape[:-1]
    rows = math.prod(lead) if lead else 1
    x2 = x.reshape(rows, F)

    itemsize = jnp.dtype(x.dtype).itemsize
    vmem_limit = _vmem_limit_bytes()
    # Spend ~3/4 of the scoped limit on the row-tile working set.
    rt = _choose_row_tile(rows, F, itemsize, (vmem_limit * 3) // 4)

    # TODO(synk): for F not a multiple of 128, fold groups of rows into the
    # lane axis in the wrapper so stores are lane-dense (avoids vst.msk partial
    # writeback); production transformer hidden dims already satisfy F % 128 == 0.

    grid = (pl.cdiv(rows, rt),)  # ragged last block is handled by Pallas;
                                 # per-row stats make partial blocks safe.

    out = pl.pallas_call(
        functools.partial(_layer_norm_kernel, eps=eps),
        out_shape=jax.ShapeDtypeStruct((rows, F), x.dtype),
        grid_spec=pltpu.PrefetchScalarGridSpec(
            num_scalar_prefetch=0,
            grid=grid,
            in_specs=[
                pl.BlockSpec((rt, F), lambda i: (i, 0)),   # x row tile
                pl.BlockSpec((1, F), lambda i: (0, 0)),    # a_2 (grid-invariant)
                pl.BlockSpec((1, F), lambda i: (0, 0)),    # b_2 (grid-invariant)
            ],
            out_specs=pl.BlockSpec((rt, F), lambda i: (i, 0)),
        ),
        compiler_params=pltpu.CompilerParams(
            dimension_semantics=("parallel",),   # rows are independent; shards
                                                 # across v7x's 2 TCs
            vmem_limit_bytes=vmem_limit,
        ),
    )(x2, a2.reshape(1, F), b2.reshape(1, F))

    return out.reshape(*lead, F)


def _reference(x, a2, b2, eps=1e-6):
    """Pure-JAX reference mirroring the PyTorch forward (unbiased std, eps on std)."""
    xf = x.astype(jnp.float32)
    mean = jnp.mean(xf, axis=-1, keepdims=True)
    var = jnp.sum((xf - mean) ** 2, axis=-1, keepdims=True) / (xf.shape[-1] - 1)
    std = jnp.sqrt(var)
    return (a2 * (xf - mean) / (std + eps) + b2).astype(x.dtype)


if __name__ == "__main__":
    B, S, F = 2, 8, 32   # batch=2, seq=8, hidden=32

    key = jax.random.PRNGKey(0)
    kx, ka, kb = jax.random.split(key, 3)

    x = jax.random.normal(kx, (B, S, F), dtype=jnp.float32)
    # Module default init is a_2=ones, b_2=zeros; perturb slightly so the
    # affine terms are actually exercised (deterministic from PRNGKey(0)).
    a2 = 1.0 + 0.1 * jax.random.normal(ka, (F,), dtype=jnp.float32)
    b2 = 0.1 * jax.random.normal(kb, (F,), dtype=jnp.float32)

    out = layer_norm(x, a2, b2)
    out = jax.block_until_ready(out)

    ref = _reference(x, a2, b2)
    # Exact arithmetic (no approx reciprocal) -> tight f32 tolerance.
    assert out.shape == ref.shape
    assert bool(jnp.all(jnp.isfinite(out))), "non-finite output"
    assert jnp.allclose(out, ref, atol=1e-5, rtol=1e-5), "mismatch vs reference"

    print("KERNEL_OK")
</pallas_src>

<mosaic_0001>
module attributes {stable_mosaic.version = 11 : i64} {
  func.func @_layer_norm_kernel(%arg0: i32, %arg1: memref<16x32xf32, #tpu.memory_space<vmem>>, %arg2: memref<1x32xf32, #tpu.memory_space<vmem>>, %arg3: memref<1x32xf32, #tpu.memory_space<vmem>>, %arg4: memref<16x32xf32, #tpu.memory_space<vmem>>) attributes {dimension_semantics = [#tpu.dimension_semantics<parallel>], iteration_bounds = array<i64: 1>, scalar_prefetch = 0 : i64, scratch_operands = 0 : i64, tpu.core_type = #tpu.core_type<tc>, window_params = [{transform_indices = @transform_0, window_bounds = array<i64: 16, 32>}, {pipeline_mode = #tpu.pipeline_mode<synchronous>, transform_indices = @transform_1, window_bounds = array<i64: 1, 32>}, {pipeline_mode = #tpu.pipeline_mode<synchronous>, transform_indices = @transform_2, window_bounds = array<i64: 1, 32>}, {transform_indices = @transform_3, window_bounds = array<i64: 16, 32>}]} {
    %c0 = arith.constant 0 : index
    %c0_0 = arith.constant 0 : index
    %0 = vector.load %arg1[%c0, %c0_0] : memref<16x32xf32, #tpu.memory_space<vmem>>, vector<16x32xf32>
    %cst = arith.constant dense<0.000000e+00> : vector<16xf32>
    %1 = vector.multi_reduction <add>, %0, %cst [1] : vector<16x32xf32> to vector<16xf32>
    %2 = vector.shape_cast %1 : vector<16xf32> to vector<16x1xf32>
    %cst_1 = arith.constant 3.200000e+01 : f32
    %3 = vector.broadcast %cst_1 : f32 to vector<16x1xf32>
    %4 = arith.divf %2, %3 : vector<16x1xf32>
    %5 = vector.broadcast %4 : vector<16x1xf32> to vector<16x32xf32>
    %6 = arith.subf %0, %5 : vector<16x32xf32>
    %7 = arith.mulf %6, %6 : vector<16x32xf32>
    %cst_2 = arith.constant dense<0.000000e+00> : vector<16xf32>
    %8 = vector.multi_reduction <add>, %7, %cst_2 [1] : vector<16x32xf32> to vector<16xf32>
    %9 = vector.shape_cast %8 : vector<16xf32> to vector<16x1xf32>
    %cst_3 = arith.constant 3.100000e+01 : f32
    %10 = vector.broadcast %cst_3 : f32 to vector<16x1xf32>
    %11 = arith.divf %9, %10 : vector<16x1xf32>
    %12 = math.sqrt %11 : vector<16x1xf32>
    %cst_4 = arith.constant 9.99999997E-7 : f32
    %13 = vector.broadcast %cst_4 : f32 to vector<16x1xf32>
    %14 = arith.addf %12, %13 : vector<16x1xf32>
    %cst_5 = arith.constant 1.000000e+00 : f32
    %15 = vector.broadcast %cst_5 : f32 to vector<16x1xf32>
    %16 = arith.divf %15, %14 : vector<16x1xf32>
    %c0_6 = arith.constant 0 : index
    %c0_7 = arith.constant 0 : index
    %17 = vector.load %arg2[%c0_6, %c0_7] : memref<1x32xf32, #tpu.memory_space<vmem>>, vector<1x32xf32>
    %18 = vector.broadcast %16 : vector<16x1xf32> to vector<16x32xf32>
    %19 = arith.mulf %6, %18 : vector<16x32xf32>
    %20 = vector.broadcast %17 : vector<1x32xf32> to vector<16x32xf32>
    %21 = arith.mulf %20, %19 : vector<16x32xf32>
    %c0_8 = arith.constant 0 : index
    %c0_9 = arith.constant 0 : index
    %22 = vector.load %arg3[%c0_8, %c0_9] : memref<1x32xf32, #tpu.memory_space<vmem>>, vector<1x32xf32>
    %23 = vector.broadcast %22 : vector<1x32xf32> to vector<16x32xf32>
    %24 = arith.addf %21, %23 : vector<16x32xf32>
    %c0_10 = arith.constant 0 : index
    %c0_11 = arith.constant 0 : index
    %25 = vector.load %arg4[%c0_10, %c0_11] : memref<16x32xf32, #tpu.memory_space<vmem>>, vector<16x32xf32>
    tpu.vector_store %arg4[%c0_10, %c0_11], %24 {strides = array<i32>} : memref<16x32xf32, #tpu.memory_space<vmem>>, vector<16x32xf32>,
    return
  }
  func.func @transform_0(%arg0: i32) -> (i32, i32) {
    %c0_i32 = arith.constant 0 : i32
    %c0_i32_0 = arith.constant 0 : i32
    return %arg0, %c0_i32 : i32, i32
  }
  func.func @transform_1(%arg0: i32) -> (i32, i32) {
    %c0_i32 = arith.constant 0 : i32
    %c0_i32_0 = arith.constant 0 : i32
    %c0_i32_1 = arith.constant 0 : i32
    return %c0_i32, %c0_i32_0 : i32, i32
  }
  func.func @transform_2(%arg0: i32) -> (i32, i32) {
    %c0_i32 = arith.constant 0 : i32
    %c0_i32_0 = arith.constant 0 : i32
    %c0_i32_1 = arith.constant 0 : i32
    return %c0_i32, %c0_i32_0 : i32, i32
  }
  func.func @transform_3(%arg0: i32) -> (i32, i32) {
    %c0_i32 = arith.constant 0 : i32
    %c0_i32_0 = arith.constant 0 : i32
    return %arg0, %c0_i32 : i32, i32
  }
}

</mosaic_0001>

<bundles_post_ra>
// kernel: tpu_custom_call.1
= control target key start
LH: loop header
LB: loop body
LE: loop exit
PB: predicated region body
PF: predicated region fallthrough
CT: control target
= control target key end

     0   :  { %8 = vsyncpa [#allocation3], 0  ;;  %s241_s0 = inlined_call_operand.hbm [shape: f32[16,32], index: 0, kind: input, shape index: {}]   ;;  %s242_s1 = inlined_call_operand.vmem [shape: f32[1,32], index: 1, kind: input, shape index: {}]   ;;  %s243_s2 = inlined_call_operand.vmem [shape: f32[1,32], index: 2, kind: input, shape index: {}]   ;;  %s244_s3 = inlined_call_operand.hbm [shape: f32[16,32], index: 3, kind: output, shape index: {}]  }
   0x1   :  { %9 = vsyncpa [#allocation4], 0  ;;  %s175_s12 = smov [#allocation2]   ;;  %s127_s16 = scalar_lea.hbm %s241_s0, 256 }
   0x2   :  { %s15_s13 = sshll.u32 %s175_s12, 4  ;;  %p128_p0 = scmp.ne.s32.totalorder %s241_s0, %s127_s16  ;;  %s16_s13 = int_to_ptr.vmem [resolvable:$true] %s15_s13 }
   0x3   :  { %p131_p1 = scmp.lt.u32.totalorder %s127_s16, %s241_s0 }
   0x5   :  { %p133_p2 = pnand %p131_p1, %p128_p0 }
   0x7   :  { %136 = shalt.err (!%p133_p2)
}
   0x8   :  { %s137_s21 = scalar_lea.vmem %s16_s13, 256  ;;  %p142_p4 = scmp.lt.s32.totalorder %s16_s13, %s16_s13 }
   0x9   :  { %p138_p3 = scmp.ne.s32.totalorder %s16_s13, %s137_s21  ;;  %p143_p5 = scmp.lt.s32.totalorder %s137_s21, %s137_s21 }
   0xb   :  { %p144_p6 = por %p143_p5, %p142_p4 }
   0xd   :  { %p145_p7 = pnand %p144_p6, %p138_p3 }
   0xf   :  { %148 = shalt.err (!%p145_p7)
}
  0x10   :  { %s176_s22 = smov 128   ;;  %s177_s23 = smov 8  }
  0x11   :  { %21 = dma.hbm_to_vmem [thread:$0]  %s241_s0, 256, %s16_s13, [#allocation3], %s176_s22, %s176_s22, %s177_s23  }
  0x12   :  { %171 = dma.done.wait [#allocation3], 256  }
  0x13   :  { %172 = vsyncadd [#allocation3], 4294967040  ;;  %vm31_vm0 = vcmask 261120   ;;  %v29_v0 = vld [vmem:[#allocation2] sm:$0xff]  ;;  %v30_v1 = vld [vmem:[#allocation2 + $0x8] sm:$0xff]  ;;  %s178_s29 = smov [#allocation5]  }
  0x14   :  { %v32_v2 = vsel %vm31_vm0, %v29_v0, 0.0  ;;  %v35_v3 = vsel %vm31_vm0, %v30_v1, 0.0  ;;  %v113_v31 = vld [vmem:[%s242_s1] ss:$0 sm:$0xff]  ;;  %s101_s30 = sshll.u32 %s178_s29, 4  ;;  %s102_s30 = int_to_ptr.vmem [resolvable:$true] %s101_s30 }
  0x15   :  { %33 = vadd.xlane.f32.xlu0 %v32_v2  ;;  %v114_v33 = vld [vmem:[%s243_s2] ss:$0 sm:$0xff]  ;;  %s149_s4 = scalar_lea.vmem %s102_s30, 256  ;;  %p154_p9 = scmp.lt.s32.totalorder %s102_s30, %s102_s30 }
  0x16   :  { %p150_p8 = scmp.ne.s32.totalorder %s102_s30, %s149_s4  ;;  %p155_p10 = scmp.lt.s32.totalorder %s149_s4, %s149_s4 }
  0x18   :  { %p156_p11 = por %p155_p10, %p154_p9 }
  0x19   :  { %36 = vadd.xlane.f32.xlu0 %v35_v3 }
  0x1a   :  { %p157_p12 = pnand %p156_p11, %p150_p8 }
  0xa2   :  { %v34_v4 = vpop.xlane.xlu0 %33 }
  0xa3   :  { %v39_v5 = vmul.f32 0.03125, %v34_v4 }
  0xa5   :  { %v41_v6 = vsub.f32 %v29_v0, %v39_v5 }
  0xa6   :  { %v37_v7 = vpop.xlane.xlu0 %36 }
  0xa7   :  { %v40_v8 = vmul.f32 0.03125, %v37_v7  ;;  %v43_v9 = vmul.f32 %v41_v6, %v41_v6 }
  0xa9   :  { %v42_v10 = vsub.f32 %v30_v1, %v40_v8  ;;  %v45_v11 = vsel %vm31_vm0, %v43_v9, 0.0 }
  0xaa   :  { %46 = vadd.xlane.f32.xlu1 %v45_v11 }
  0xab   :  { %v44_v12 = vmul.f32 %v42_v10, %v42_v10 }
  0xad   :  { %v48_v13 = vsel %vm31_vm0, %v44_v12, 0.0 }
  0xae   :  { %49 = vadd.xlane.f32.xlu1 %v48_v13 }
 0x137   :  { %v47_v14 = vpop.xlane.xlu1 %46 }
 0x138   :  { %v52_v15 = vmul.f32 0.032258064, %v47_v14 }
 0x13a   :  { %119 = vrsqrt.f32 %v52_v15  ;;  %vm56_vm1 = vcmp.eq.f32.partialorder %v52_v15, inf  ;;  %v59_v20 = vand.u32 2147483648, %v52_v15  ;;  %vm58_vm2 = vcmp.eq.f32.partialorder %v52_v15, 0.0 }
 0x13b   :  { %v50_v16 = vpop.xlane.xlu1 %49 }
 0x13c   :  { %v53_v17 = vmul.f32 0.032258064, %v50_v16 }
 0x13e   :  { %121 = vrsqrt.f32 %v53_v17  ;;  %vm63_vm3 = vcmp.eq.f32.partialorder %v53_v17, inf  ;;  %v66_v26 = vand.u32 2147483648, %v53_v17  ;;  %vm65_vm4 = vcmp.eq.f32.partialorder %v53_v17, 0.0 }
 0x144   :  { %v120_v18 = vpop.eup %119 }
 0x145   :  { %v55_v19 = vmul.f32 %v120_v18, %v52_v15 }
 0x147   :  { %v57_v21 = vsel %vm56_vm1, %v52_v15, %v55_v19 }
 0x148   :  { %v122_v22 = vpop.eup %121  ;;  %v60_v23 = vsel %vm58_vm2, %v59_v20, %v57_v21 }
 0x149   :  { %v68_v24 = vadd.f32 1e-06, %v60_v23  ;;  %v62_v25 = vmul.f32 %v122_v22, %v53_v17 }
 0x14b   :  { %123 = vrcp.f32 %v68_v24  ;;  %v64_v27 = vsel %vm63_vm3, %v53_v17, %v62_v25 }
 0x14c   :  { %v67_v28 = vsel %vm65_vm4, %v66_v26, %v64_v27 }
 0x14d   :  { %v69_v29 = vadd.f32 1e-06, %v67_v28 }
 0x14f   :  { %125 = vrcp.f32 %v69_v29 }
 0x155   :  { %v124_v30 = vpop.eup %123 }
 0x156   :  { %v75_v32 = vmul.f32 %v124_v30, %v41_v6 }
 0x158   :  { %v83_v34 = vmul.f32 %v113_v31, %v75_v32 }
 0x159   :  { %v126_v35 = vpop.eup %125 }
 0x15a   :  { %v76_v36 = vmul.f32 %v126_v35, %v42_v10  ;;  %v92_v37 = vadd.f32 %v114_v33, %v83_v34 }
 0x15c   :  { %v84_v38 = vmul.f32 %v113_v31, %v76_v36  ;;  %94 = vst.msk [vmem:[#allocation5] sm:$0xff] %vm31_vm0, %v92_v37 }
 0x15e   :  { %v93_v39 = vadd.f32 %v114_v33, %v84_v38 }
 0x160   :  { %95 = vst.msk [vmem:[#allocation5 + $0x8] sm:$0xff] %vm31_vm0, %v93_v39 }
 0x161   :  { %160 = shalt.err (!%p157_p12)
}
 0x162   :  { %s161_s5 = scalar_lea.hbm %s244_s3, 256 }
 0x163   :  { %p162_p13 = scmp.ne.s32.totalorder %s244_s3, %s161_s5  ;;  %p165_p0 = scmp.lt.u32.totalorder %s161_s5, %s244_s3 }
 0x165   :  { %p167_p1 = pnand %p165_p0, %p162_p13 }
 0x167   :  { %170 = shalt.err (!%p167_p1)
}
 0x168   :  { %107 = dma.vmem_to_hbm [thread:$0]  %s102_s30, 256, %s244_s3, [#allocation4], %s176_s22, %s176_s22, %s177_s23  }
 0x169   :  { %173 = dma.done.wait [#allocation4], 256  }
 0x16a   :  { %174 = vsyncadd [#allocation4], 4294967040 }
 0x16b   :  { %111 = vsyncpa [#allocation3], 1 }
 0x16c   :  { %112 = vsyncpa [#allocation4], 1 }

</bundles_post_ra>
